<compile_context>
chip_gen: v7x
topology: tpu7x:2x2x1
jax: 0.10.0
libtpu: 0.0.40
codegen_flags: <defaults>
</compile_context>

<pallas_src>
import math
from functools import partial

import jax
import jax.numpy as jnp
from jax.experimental import pallas as pl
from jax.experimental.pallas import tpu as pltpu


def _round_up(x, m):
    return ((x + m - 1) // m) * m


# ----------------------- tiled matmul (nn.Linear, bias=False) -----------------------

def _matmul_kernel(x_ref, w_ref, o_ref, acc_ref):
    @pl.when(pl.program_id(2) == 0)
    def _():
        acc_ref[...] = jnp.zeros_like(acc_ref)

    acc_ref[...] += jnp.dot(
        x_ref[...], w_ref[...], preferred_element_type=jnp.float32
    )

    @pl.when(pl.program_id(2) == pl.num_programs(2) - 1)
    def _():
        o_ref[...] = acc_ref[...].astype(o_ref.dtype)


def pallas_linear(x2d, w, *, tm=256, tn=512, tk=512):
    """x2d @ w, tiled with an f32 VMEM accumulator (K innermost / 'arbitrary')."""
    M, K = x2d.shape
    Kw, N = w.shape
    assert K == Kw

    # If a dim fits inside the preferred tile, use the full dim (always a legal
    # block and avoids any padding copy); otherwise use the aligned tile.
    tm = M if M <= tm else tm
    tn = N if N <= tn else tn
    tk = K if K <= tk else tk
    Mp, Np, Kp = _round_up(M, tm), _round_up(N, tn), _round_up(K, tk)

    # TODO(synk): handle a ragged M tail with a masked final block instead of
    # padding the whole activation tensor (extra HBM pass at production M).
    xp = x2d if (Mp == M and Kp == K) else jnp.pad(x2d, ((0, Mp - M), (0, Kp - K)))
    wp = w if (Kp == K and Np == N) else jnp.pad(w, ((0, Kp - K), (0, Np - N)))

    out = pl.pallas_call(
        _matmul_kernel,
        out_shape=jax.ShapeDtypeStruct((Mp, Np), x2d.dtype),
        grid=(Mp // tm, Np // tn, Kp // tk),
        in_specs=[
            pl.BlockSpec((tm, tk), lambda i, j, k: (i, k)),
            pl.BlockSpec((tk, tn), lambda i, j, k: (k, j)),
        ],
        out_specs=pl.BlockSpec((tm, tn), lambda i, j, k: (i, j)),
        scratch_shapes=[pltpu.VMEM((tm, tn), jnp.float32)],
        compiler_params=pltpu.CompilerParams(
            dimension_semantics=("parallel", "parallel", "arbitrary"),
            vmem_limit_bytes=32 * 1024 * 1024,
        ),
    )(xp, wp)
    return out if (Mp == M and Np == N) else out[:M, :N]


# ------------------------------- grouped attention ----------------------------------

def _iasa_attn_kernel(q_ref, klo_ref, khi_ref, vlo_ref, vhi_ref, kg_ref, vg_ref,
                      o_ref, *, heads, scale):
    # Lane-dense blocks (heads folded into the channel/lane axis):
    #   q:        (1, 1, gs, H*dq)
    #   klo/khi:  (1, 1, gs, H*dq)   local window of group g = [block g ; block g+1]
    #   vlo/vhi:  (1, 1, gs, H*dv)
    #   kg:       (M,  H*dq)         global tokens (constant index_map -> resident)
    #   vg:       (M,  H*dv)
    #   o:        (1, 1, gs, H*dv)
    # All operands stay in their storage dtype (bf16 in production); only the
    # score/softmax path and the matmul accumulators are f32.
    q = q_ref[0, 0]
    klo = klo_ref[0, 0]
    khi = khi_ref[0, 0]
    vlo = vlo_ref[0, 0]
    vhi = vhi_ref[0, 0]
    kg = kg_ref[...]
    vg = vg_ref[...]

    dq = q.shape[-1] // heads
    dv = vlo.shape[-1] // heads

    def scores(qh, kk):
        return jax.lax.dot_general(
            qh, kk, (((1,), (1,)), ((), ())), preferred_element_type=jnp.float32
        ) * scale

    for h in range(heads):                       # static unroll; heads = lane slices
        qh = q[:, h * dq:(h + 1) * dq]
        klo_h = klo[:, h * dq:(h + 1) * dq]
        khi_h = khi[:, h * dq:(h + 1) * dq]
        kg_h = kg[:, h * dq:(h + 1) * dq]
        vlo_h = vlo[:, h * dv:(h + 1) * dv]
        vhi_h = vhi[:, h * dv:(h + 1) * dv]
        vg_h = vg[:, h * dv:(h + 1) * dv]

        # --- local window attention: one softmax over the two gs-sized key
        #     blocks; no sublane concat of K/V, two accumulating p@v matmuls.
        s_lo = scores(qh, klo_h)                 # (gs, gs) f32
        s_hi = scores(qh, khi_h)                 # (gs, gs) f32
        m_loc = jnp.maximum(jnp.max(s_lo, axis=-1, keepdims=True),
                            jnp.max(s_hi, axis=-1, keepdims=True))
        p_lo = jnp.exp(s_lo - m_loc)
        p_hi = jnp.exp(s_hi - m_loc)
        den_loc = (jnp.sum(p_lo, axis=-1, keepdims=True)
                   + jnp.sum(p_hi, axis=-1, keepdims=True))
        o_loc = (jnp.dot(p_lo.astype(vlo_h.dtype), vlo_h,
                         preferred_element_type=jnp.float32)
                 + jnp.dot(p_hi.astype(vhi_h.dtype), vhi_h,
                           preferred_element_type=jnp.float32))
        o_loc = o_loc * pl.reciprocal(den_loc, approx=True)

        # --- global-token attention (separate softmax, as in the reference).
        s_g = scores(qh, kg_h)                   # (gs, M) f32
        m_g = jnp.max(s_g, axis=-1, keepdims=True)
        p_g = jnp.exp(s_g - m_g)
        den_g = jnp.sum(p_g, axis=-1, keepdims=True)
        o_g = jnp.dot(p_g.astype(vg_h.dtype), vg_h,
                      preferred_element_type=jnp.float32)
        o_g = o_g * pl.reciprocal(den_g, approx=True)

        # Write this head's lanes directly (no outs list / lane concat epilogue).
        o_ref[0, 0, :, h * dv:(h + 1) * dv] = (o_loc + o_g).astype(o_ref.dtype)


def pallas_grouped_attention(q_g, k_blk, v_blk, kg, vg, heads):
    # q_g:   (B, ng,   gs, qk_dim)   lane-dense
    # k_blk: (B, ng+1, gs, qk_dim)   padded K, gs-sized blocks (overlap via g/g+1)
    # v_blk: (B, ng+1, gs, dim)
    # kg:    (M, qk_dim)   vg: (M, dim)
    B, ng, gs, qk_dim = q_g.shape
    dim = v_blk.shape[-1]
    M = kg.shape[0]
    scale = 1.0 / math.sqrt(qk_dim // heads)
    kernel = partial(_iasa_attn_kernel, heads=heads, scale=scale)
    return pl.pallas_call(
        kernel,
        out_shape=jax.ShapeDtypeStruct((B, ng, gs, dim), q_g.dtype),
        grid=(B, ng),
        in_specs=[
            pl.BlockSpec((1, 1, gs, qk_dim), lambda b, g: (b, g, 0, 0)),
            pl.BlockSpec((1, 1, gs, qk_dim), lambda b, g: (b, g, 0, 0)),
            pl.BlockSpec((1, 1, gs, qk_dim), lambda b, g: (b, g + 1, 0, 0)),
            pl.BlockSpec((1, 1, gs, dim), lambda b, g: (b, g, 0, 0)),
            pl.BlockSpec((1, 1, gs, dim), lambda b, g: (b, g + 1, 0, 0)),
            pl.BlockSpec((M, qk_dim), lambda b, g: (0, 0)),   # fetched once, resident
            pl.BlockSpec((M, dim), lambda b, g: (0, 0)),      # fetched once, resident
        ],
        out_specs=pl.BlockSpec((1, 1, gs, dim), lambda b, g: (b, g, 0, 0)),
        compiler_params=pltpu.CompilerParams(
            dimension_semantics=("parallel", "parallel"),
            vmem_limit_bytes=32 * 1024 * 1024,
        ),
    )(q_g, k_blk, k_blk, v_blk, v_blk, kg, vg)


# ---------------------------------- IASA forward ------------------------------------

def iasa_forward(params, normed_x, idx_last, k_global, v_global, heads, group_size,
                 compute_dtype=jnp.bfloat16):
    wq, wk, wv, wp = params          # stored as (in_dim, out_dim); x @ w == Linear(x)
    B, N, dim = normed_x.shape
    qk_dim = wq.shape[1]
    H = heads
    dq, dv = qk_dim // H, dim // H
    M = k_global.shape[1]

    # Single token gather on x (permutation commutes with the row-wise Linear).
    idx = idx_last[..., 0]                                    # (B, N) int32
    xg = jnp.take_along_axis(normed_x, idx[..., None], axis=1)

    # Fused Q|K|V projection: one tiled Pallas matmul over the activations,
    # run in the compute dtype (bf16 in production), f32 accumulation.
    xg = xg.astype(compute_dtype)
    wqkv = jnp.concatenate([wq, wk, wv], axis=1).astype(compute_dtype)
    qkv = pallas_linear(xg.reshape(B * N, dim), wqkv).reshape(B, N, -1)
    q = qkv[..., :qk_dim]
    k = qkv[..., qk_dim:2 * qk_dim]
    v = qkv[..., 2 * qk_dim:]

    gs = min(N, group_size)
    ng = -(-N // gs)
    pad_n = ng * gs - N

    # Reflect-pad tails (torch.flip of the trailing segment).
    q_pad = jnp.concatenate([q, jnp.flip(q[:, N - pad_n:N, :], axis=1)], axis=1)
    k_pad = jnp.concatenate([k, jnp.flip(k[:, N - pad_n - gs:N, :], axis=1)], axis=1)
    v_pad = jnp.concatenate([v, jnp.flip(v[:, N - pad_n - gs:N, :], axis=1)], axis=1)

    # Lane-dense group views.  The overlapping 2*gs window of group g is read
    # directly out of k_pad/v_pad as blocks (g, g+1) by the BlockSpecs.
    q_g = q_pad.reshape(B, ng, gs, qk_dim)
    k_blk = k_pad.reshape(B, ng + 1, gs, qk_dim)
    v_blk = v_pad.reshape(B, ng + 1, gs, dim)

    # Global K/V laid out in the same channel order as q/k/v (c = h*d_head + d).
    kg = k_global.transpose(1, 0, 2).reshape(M, H * dq).astype(compute_dtype)
    vg = v_global.transpose(1, 0, 2).reshape(M, H * dv).astype(compute_dtype)

    out = pallas_grouped_attention(q_g, k_blk, v_blk, kg, vg, H)   # (B, ng, gs, dim)

    # 'b ng gs (h d) -> b (ng gs) (h d)', drop padding.
    out = out.reshape(B, ng * gs, dim)[:, :N, :]

    # out.scatter(dim=-2, index=idx, src=out): inverse of the gather permutation.
    b_idx = jnp.arange(B)[:, None]
    out = out.at[b_idx, idx, :].set(out)

    # Final projection (tiled Pallas matmul) and cast back to the input dtype.
    out = pallas_linear(out.reshape(B * N, dim),
                        wp.astype(compute_dtype)).reshape(B, N, dim)
    return out.astype(normed_x.dtype)


# ------------------------------- pure-JAX reference ---------------------------------

def ref_forward(params, normed_x, idx_last, k_global, v_global, heads, group_size):
    wq, wk, wv, wp = params
    B, N, dim = normed_x.shape
    qk_dim = wq.shape[1]
    H = heads
    dq, dv = qk_dim // H, dim // H
    q, k, v = normed_x @ wq, normed_x @ wk, normed_x @ wv
    idx = idx_last[..., 0]
    q = jnp.take_along_axis(q, idx[..., None], axis=1)
    k = jnp.take_along_axis(k, idx[..., None], axis=1)
    v = jnp.take_along_axis(v, idx[..., None], axis=1)
    gs = min(N, group_size)
    ng = -(-N // gs)
    pad_n = ng * gs - N
    q_pad = jnp.concatenate([q, jnp.flip(q[:, N - pad_n:N, :], axis=1)], axis=1)
    k_pad = jnp.concatenate([k, jnp.flip(k[:, N - pad_n - gs:N, :], axis=1)], axis=1)
    v_pad = jnp.concatenate([v, jnp.flip(v[:, N - pad_n - gs:N, :], axis=1)], axis=1)
    q_g = q_pad.reshape(B, ng, gs, H, dq).transpose(0, 1, 3, 2, 4)
    k_w = jnp.stack([k_pad[:, g * gs:(g + 2) * gs] for g in range(ng)], axis=1)
    v_w = jnp.stack([v_pad[:, g * gs:(g + 2) * gs] for g in range(ng)], axis=1)
    k_w = k_w.reshape(B, ng, 2 * gs, H, dq).transpose(0, 1, 3, 2, 4)
    v_w = v_w.reshape(B, ng, 2 * gs, H, dv).transpose(0, 1, 3, 2, 4)

    def sdpa(qq, kk, vv):
        s = jnp.einsum('...qd,...kd->...qk', qq, kk) / math.sqrt(qq.shape[-1])
        p = jax.nn.softmax(s, axis=-1)
        return jnp.einsum('...qk,...kd->...qd', p, vv)

    out = sdpa(q_g, k_w, v_w) + sdpa(q_g, k_global[None, None], v_global[None, None])
    out = out.transpose(0, 1, 3, 2, 4).reshape(B, ng * gs, dim)[:, :N, :]
    b_idx = jnp.arange(B)[:, None]
    out = out.at[b_idx, idx, :].set(out)
    return out @ wp


# --------------------------------------- main ----------------------------------------

if __name__ == "__main__":
    key = jax.random.PRNGKey(0)
    B, N, dim, qk_dim, heads, group_size, M = 2, 40, 128, 64, 4, 16, 16
    dq, dv = qk_dim // heads, dim // heads

    k0, k1, k2, k3, k4, k5, k6, k7 = jax.random.split(key, 8)
    x = jax.random.normal(k0, (B, N, dim), jnp.float32)
    # idx_last: per-batch permutation of tokens, shape (B, N, 1), int32
    idx_last = jnp.stack(
        [jax.random.permutation(kk, N) for kk in jax.random.split(k1, B)]
    ).astype(jnp.int32)[..., None]
    k_global = jax.random.normal(k2, (heads, M, dq), jnp.float32)
    v_global = jax.random.normal(k3, (heads, M, dv), jnp.float32)

    # deterministic synthetic weights (nn.Linear(dim, out, bias=False) == x @ W)
    wq = jax.random.normal(k4, (dim, qk_dim), jnp.float32) * 0.05
    wk = jax.random.normal(k5, (dim, qk_dim), jnp.float32) * 0.05
    wv = jax.random.normal(k6, (dim, dim), jnp.float32) * 0.05
    wp = jax.random.normal(k7, (dim, dim), jnp.float32) * 0.05
    params = (wq, wk, wv, wp)

    ref = ref_forward(params, x, idx_last, k_global, v_global, heads, group_size)

    # Exact-dtype path (f32 operands): tight tolerance, only approx-recip noise.
    out_f32 = jax.block_until_ready(
        iasa_forward(params, x, idx_last, k_global, v_global, heads, group_size,
                     compute_dtype=jnp.float32))
    assert out_f32.shape == (B, N, dim)
    err32 = float(jnp.max(jnp.abs(out_f32 - ref)))
    assert jnp.allclose(out_f32, ref, atol=2e-3, rtol=2e-3), f"f32 max abs err {err32}"

    # Production path: bf16 storage / MXU operands, f32 accumulation.
    out_bf = jax.block_until_ready(
        iasa_forward(params, x, idx_last, k_global, v_global, heads, group_size,
                     compute_dtype=jnp.bfloat16))
    assert out_bf.shape == (B, N, dim)
    errbf = float(jnp.max(jnp.abs(out_bf.astype(jnp.float32) - ref)))
    assert jnp.allclose(out_bf.astype(jnp.float32), ref, atol=6e-2, rtol=6e-2), \
        f"bf16 max abs err {errbf}"

    print("KERNEL_OK")
</pallas_src>

<mosaic_0001>
module attributes {stable_mosaic.version = 11 : i64} {
  func.func @_matmul_kernel(%arg0: i32, %arg1: i32, %arg2: i32, %arg3: memref<80x128xf32, #tpu.memory_space<vmem>>, %arg4: memref<128x256xf32, #tpu.memory_space<vmem>>, %arg5: memref<80x256xf32, #tpu.memory_space<vmem>>, %arg6: memref<80x256xf32, #tpu.memory_space<vmem>>) attributes {dimension_semantics = [#tpu.dimension_semantics<parallel>, #tpu.dimension_semantics<parallel>, #tpu.dimension_semantics<arbitrary>], iteration_bounds = array<i64: 1, 1, 1>, scalar_prefetch = 0 : i64, scratch_operands = 1 : i64, tpu.core_type = #tpu.core_type<tc>, window_params = [{transform_indices = @transform_0, window_bounds = array<i64: 80, 128>}, {transform_indices = @transform_1, window_bounds = array<i64: 128, 256>}, {transform_indices = @transform_2, window_bounds = array<i64: 80, 256>}]} {
    %c0_i32 = arith.constant 0 : i32
    %0 = arith.cmpi eq, %arg2, %c0_i32 : i32
    %1 = arith.extui %0 : i1 to i32
    %c0_i32_0 = arith.constant 0 : i32
    %2 = arith.cmpi ne, %1, %c0_i32_0 : i32
    scf.if %2 {
      %cst_10 = arith.constant 0.000000e+00 : f32
      %12 = vector.broadcast %cst_10 : f32 to vector<80x256xf32>
      %c0_11 = arith.constant 0 : index
      %c0_12 = arith.constant 0 : index
      %13 = vector.load %arg6[%c0_11, %c0_12] : memref<80x256xf32, #tpu.memory_space<vmem>>, vector<80x256xf32>
      tpu.vector_store %arg6[%c0_11, %c0_12], %12 {strides = array<i32>} : memref<80x256xf32, #tpu.memory_space<vmem>>, vector<80x256xf32>,
    } else {
    }
    %c0 = arith.constant 0 : index
    %c0_1 = arith.constant 0 : index
    %3 = vector.load %arg6[%c0, %c0_1] : memref<80x256xf32, #tpu.memory_space<vmem>>, vector<80x256xf32>
    %c0_2 = arith.constant 0 : index
    %c0_3 = arith.constant 0 : index
    %4 = vector.load %arg3[%c0_2, %c0_3] : memref<80x128xf32, #tpu.memory_space<vmem>>, vector<80x128xf32>
    %c0_4 = arith.constant 0 : index
    %c0_5 = arith.constant 0 : index
    %5 = vector.load %arg4[%c0_4, %c0_5] : memref<128x256xf32, #tpu.memory_space<vmem>>, vector<128x256xf32>
    %cst = arith.constant dense<0.000000e+00> : vector<80x256xf32>
    %6 = tpu.matmul %4, %5, %cst {dimension_numbers = #tpu.dot_dimension_numbers<[1], [0], [0], [1], [0, 0, 1, 1], [], []>} : vector<80x128xf32>, vector<128x256xf32>, vector<80x256xf32> -> vector<80x256xf32>
    %7 = arith.addf %3, %6 : vector<80x256xf32>
    %c0_6 = arith.constant 0 : index
    %c0_7 = arith.constant 0 : index
    %8 = vector.load %arg6[%c0_6, %c0_7] : memref<80x256xf32, #tpu.memory_space<vmem>>, vector<80x256xf32>
    tpu.vector_store %arg6[%c0_6, %c0_7], %7 {strides = array<i32>} : memref<80x256xf32, #tpu.memory_space<vmem>>, vector<80x256xf32>,
    %c0_i32_8 = arith.constant 0 : i32
    %9 = arith.cmpi eq, %arg2, %c0_i32_8 : i32
    %10 = arith.extui %9 : i1 to i32
    %c0_i32_9 = arith.constant 0 : i32
    %11 = arith.cmpi ne, %10, %c0_i32_9 : i32
    scf.if %11 {
      %c0_10 = arith.constant 0 : index
      %c0_11 = arith.constant 0 : index
      %12 = vector.load %arg6[%c0_10, %c0_11] : memref<80x256xf32, #tpu.memory_space<vmem>>, vector<80x256xf32>
      %c0_12 = arith.constant 0 : index
      %c0_13 = arith.constant 0 : index
      %13 = vector.load %arg5[%c0_12, %c0_13] : memref<80x256xf32, #tpu.memory_space<vmem>>, vector<80x256xf32>
      tpu.vector_store %arg5[%c0_12, %c0_13], %12 {strides = array<i32>} : memref<80x256xf32, #tpu.memory_space<vmem>>, vector<80x256xf32>,
    } else {
    }
    return
  }
  func.func @transform_0(%arg0: i32, %arg1: i32, %arg2: i32) -> (i32, i32) {
    %c0_i32 = arith.constant 0 : i32
    return %arg0, %arg2 : i32, i32
  }
  func.func @transform_1(%arg0: i32, %arg1: i32, %arg2: i32) -> (i32, i32) {
    %c0_i32 = arith.constant 0 : i32
    return %arg2, %arg1 : i32, i32
  }
  func.func @transform_2(%arg0: i32, %arg1: i32, %arg2: i32) -> (i32, i32) {
    %c0_i32 = arith.constant 0 : i32
    return %arg0, %arg1 : i32, i32
  }
}

</mosaic_0001>

<bundles_post_ra>
// kernel: tpu_custom_call.1
= control target key start
LH: loop header
LB: loop body
LE: loop exit
PB: predicated region body
PF: predicated region fallthrough
CT: control target
= control target key end

     0   :  { %7 = vsyncpa [#allocation4], 0  ;;  %s555_s0 = inlined_call_operand.hbm [shape: f32[80,128], index: 0, kind: input, shape index: {}]   ;;  %s556_s1 = inlined_call_operand.hbm [shape: f32[128,256], index: 1, kind: input, shape index: {}]   ;;  %s557_s2 = inlined_call_operand.hbm [shape: f32[80,256], index: 2, kind: output, shape index: {}]  }
   0x1   :  { %8 = vsyncpa [#allocation7], 0 }
   0x2   :  { %9 = vsyncpa [#allocation5], 0  ;;  %s480_s9 = smov [#allocation3]   ;;  %s408_s13 = scalar_lea.hbm %s555_s0, 1280 }
   0x3   :  { %s15_s10 = sshll.u32 %s480_s9, 4  ;;  %p409_p0 = scmp.ne.s32.totalorder %s555_s0, %s408_s13  ;;  %s16_s10 = int_to_ptr.vmem [resolvable:$true] %s15_s10 }
   0x4   :  { %p412_p1 = scmp.lt.u32.totalorder %s408_s13, %s555_s0 }
   0x6   :  { %p414_p2 = pnand %p412_p1, %p409_p0 }
   0x8   :  { %417 = shalt.err (!%p414_p2)
}
   0x9   :  { %s418_s18 = scalar_lea.vmem %s16_s10, 1280  ;;  %p423_p4 = scmp.lt.s32.totalorder %s16_s10, %s16_s10 }
   0xa   :  { %p419_p3 = scmp.ne.s32.totalorder %s16_s10, %s418_s18  ;;  %p424_p5 = scmp.lt.s32.totalorder %s418_s18, %s418_s18 }
   0xc   :  { %p425_p6 = por %p424_p5, %p423_p4 }
   0xe   :  { %p426_p7 = pnand %p425_p6, %p419_p3 }
  0x10   :  { %429 = shalt.err (!%p426_p7)
}
  0x11   :  { %s481_s19 = smov 128   ;;  %s482_s20 = smov 8  }
  0x12   :  { %21 = dma.hbm_to_vmem [thread:$0]  %s555_s0, 1280, %s16_s10, [#allocation4], %s481_s19, %s481_s19, %s482_s20  }
  0x13   :  { %s483_s23 = smov [#allocation6]   ;;  %s430_s27 = scalar_lea.hbm %s556_s1, 4096 }
  0x14   :  { %s27_s24 = sshll.u32 %s483_s23, 4  ;;  %p431_p8 = scmp.ne.s32.totalorder %s556_s1, %s430_s27  ;;  %s28_s24 = int_to_ptr.vmem [resolvable:$true] %s27_s24 }
  0x15   :  { %p434_p9 = scmp.lt.u32.totalorder %s430_s27, %s556_s1 }
  0x17   :  { %p436_p10 = pnand %p434_p9, %p431_p8 }
  0x19   :  { %439 = shalt.err (!%p436_p10)
}
  0x1a   :  { %s440_s4 = scalar_lea.vmem %s28_s24, 4096  ;;  %p445_p12 = scmp.lt.s32.totalorder %s28_s24, %s28_s24 }
  0x1b   :  { %p441_p11 = scmp.ne.s32.totalorder %s28_s24, %s440_s4  ;;  %p446_p13 = scmp.lt.s32.totalorder %s440_s4, %s440_s4 }
  0x1d   :  { %p447_p0 = por %p446_p13, %p445_p12 }
  0x1f   :  { %p448_p1 = pnand %p447_p0, %p441_p11 }
  0x21   :  { %451 = shalt.err (!%p448_p1)
}
  0x22   :  { %s484_s0 = smov 256   ;;  %s485_s5 = smov 16  }
  0x23   :  { %33 = dma.hbm_to_vmem [thread:$0]  %s556_s1, 4096, %s28_s24, [#allocation7], %s484_s0, %s484_s0, %s485_s5  }
  0x24   :  { %474 = dma.done.wait [#allocation4], 1280  }
  0x25   :  { %475 = vsyncadd [#allocation4], 4294966016 }
  0x26   :  { %476 = dma.done.wait [#allocation7], 4096  }
  0x27   :  { %477 = vsyncadd [#allocation7], 4294963200  ;;  %v486_v0 = vmov 0.0   ;;  %v95_v1 = vld [vmem:[#allocation6 + $0x8] sm:$0xff]  ;;  %v97_v2 = vld [vmem:[#allocation6 + $0x18] sm:$0xff]  ;;  %s487_s1 = smov [#allocation8]  }
  0x28   :  { %190 = vmatprep.mubr.f32.mxu0 %v486_v0  ;;  %220 = vmatprep.mubr.f32.mxu1 %v486_v0  ;;  %v94_v3 = vld [vmem:[#allocation6] sm:$0xff]  ;;  %v352_v4 = vpack.c.bf16 %v97_v2, %v95_v1  ;;  %v96_v5 = vld [vmem:[#allocation6 + $0x10] sm:$0xff]  ;;  %v99_v6 = vld [vmem:[#allocation6 + $0x28] sm:$0xff]  ;;  %s339_s8 = sshll.u32 %s487_s1, 4  ;;  %s340_s8 = int_to_ptr.vmem [resolvable:$true] %s339_s8 }
  0x29   :  { %v101_v7 = vld [vmem:[#allocation6 + $0x38] sm:$0xff]  ;;  %v354_v8 = vpack.c.bf16 %v96_v5, %v94_v3  ;;  %v98_v10 = vld [vmem:[#allocation6 + $0x20] sm:$0xff]  ;;  %v100_v11 = vld [vmem:[#allocation6 + $0x30] sm:$0xff]  ;;  %s452_s9 = scalar_lea.vmem %s340_s8, 2560  ;;  %p457_p3 = scmp.lt.s32.totalorder %s340_s8, %s340_s8 }
  0x2a   :  { %v356_v9 = vpack.c.bf16 %v101_v7, %v99_v6  ;;  %v103_v12 = vld [vmem:[#allocation6 + $0x48] sm:$0xff]  ;;  %353 = vmatprep.subr.bf16.mxu0 %v352_v4  ;;  %384 = vmatprep.subr.bf16.mxu1 %v352_v4  ;;  %v105_v13 = vld [vmem:[#allocation6 + $0x58] sm:$0xff]  ;;  %v358_v14 = vpack.c.bf16 %v100_v11, %v98_v10  ;;  %v102_v16 = vld [vmem:[#allocation6 + $0x40] sm:$0xff]  ;;  %p453_p2 = scmp.ne.s32.totalorder %s340_s8, %s452_s9  ;;  %p458_p4 = scmp.lt.s32.totalorder %s452_s9, %s452_s9 }
  0x2b   :  { %355 = vmatpush1.bf16.msra.mxu0 %v354_v8  ;;  %392 = vmatpush1.bf16.msra.mxu1 %v354_v8  ;;  %v360_v15 = vpack.c.bf16 %v105_v13, %v103_v12  ;;  %v104_v17 = vld [vmem:[#allocation6 + $0x50] sm:$0xff]  ;;  %v107_v18 = vld [vmem:[#allocation6 + $0x68] sm:$0xff]  ;;  %v109_v19 = vld [vmem:[#allocation6 + $0x78] sm:$0xff] }
  0x2c   :  { %357 = vmatprep.subr.bf16.mxu0 %v356_v9  ;;  %385 = vmatprep.subr.bf16.mxu1 %v356_v9  ;;  %v362_v20 = vpack.c.bf16 %v104_v17, %v102_v16  ;;  %v364_v21 = vpack.c.bf16 %v109_v19, %v107_v18  ;;  %v106_v22 = vld [vmem:[#allocation6 + $0x60] sm:$0xff]  ;;  %v108_v23 = vld [vmem:[#allocation6 + $0x70] sm:$0xff]  ;;  %v111_v24 = vld [vmem:[#allocation6 + $0x88] sm:$0xff]  ;;  %p459_p5 = por %p458_p4, %p457_p3 }
  0x2d   :  { %v113_v25 = vld [vmem:[#allocation6 + $0x98] sm:$0xff]  ;;  %v366_v26 = vpack.c.bf16 %v108_v23, %v106_v22  ;;  %v110_v28 = vld [vmem:[#allocation6 + $0x80] sm:$0xff]  ;;  %v112_v29 = vld [vmem:[#allocation6 + $0x90] sm:$0xff] }
  0x2e   :  { %v368_v27 = vpack.c.bf16 %v113_v25, %v111_v24  ;;  %v115_v30 = vld [vmem:[#allocation6 + $0xa8] sm:$0xff]  ;;  %v117_v31 = vld [vmem:[#allocation6 + $0xb8] sm:$0xff]  ;;  %v370_v32 = vpack.c.bf16 %v112_v29, %v110_v28  ;;  %v114_v34 = vld [vmem:[#allocation6 + $0xa0] sm:$0xff]  ;;  %p460_p6 = pnand %p459_p5, %p453_p2 }
  0x2f   :  { %359 = vmatpush1.bf16.msra.mxu0 %v358_v14  ;;  %393 = vmatpush1.bf16.msra.mxu1 %v358_v14  ;;  %v372_v33 = vpack.c.bf16 %v117_v31, %v115_v30  ;;  %v116_v35 = vld [vmem:[#allocation6 + $0xb0] sm:$0xff]  ;;  %v119_v36 = vld [vmem:[#allocation6 + $0xc8] sm:$0xff]  ;;  %v121_v37 = vld [vmem:[#allocation6 + $0xd8] sm:$0xff] }
  0x30   :  { %361 = vmatprep.subr.bf16.mxu0 %v360_v15  ;;  %386 = vmatprep.subr.bf16.mxu1 %v360_v15  ;;  %v374_v38 = vpack.c.bf16 %v116_v35, %v114_v34  ;;  %v376_v39 = vpack.c.bf16 %v121_v37, %v119_v36  ;;  %v118_v40 = vld [vmem:[#allocation6 + $0xc0] sm:$0xff]  ;;  %v120_v41 = vld [vmem:[#allocation6 + $0xd0] sm:$0xff]  ;;  %v123_v42 = vld [vmem:[#allocation6 + $0xe8] sm:$0xff] }
  0x31   :  { %v125_v43 = vld [vmem:[#allocation6 + $0xf8] sm:$0xff]  ;;  %v378_v44 = vpack.c.bf16 %v120_v41, %v118_v40  ;;  %v122_v46 = vld [vmem:[#allocation6 + $0xe0] sm:$0xff]  ;;  %v124_v47 = vld [vmem:[#allocation6 + $0xf0] sm:$0xff] }
  0x32   :  { %v380_v45 = vpack.c.bf16 %v125_v43, %v123_v42  ;;  %v382_v48 = vpack.c.bf16 %v124_v47, %v122_v46  ;;  %v84_v49 = vld [vmem:[#allocation3] sm:$0xff]  ;;  %v89_v50 = vld [vmem:[#allocation3 + $0x28] sm:$0xff]  ;;  %v90_v52 = vld [vmem:[#allocation3 + $0x30] sm:$0xff] }
  0x33   :  { %363 = vmatpush1.bf16.msra.mxu0 %v362_v20  ;;  %394 = vmatpush1.bf16.msra.mxu1 %v362_v20  ;;  %v85_v51 = vld [vmem:[#allocation3 + $0x8] sm:$0xff]  ;;  %v86_v53 = vld [vmem:[#allocation3 + $0x10] sm:$0xff]  ;;  %v91_v54 = vld [vmem:[#allocation3 + $0x38] sm:$0xff] }
  0x34   :  { %365 = vmatprep.subr.bf16.mxu0 %v364_v21  ;;  %387 = vmatprep.subr.bf16.mxu1 %v364_v21  ;;  %v87_v55 = vld [vmem:[#allocation3 + $0x18] sm:$0xff]  ;;  %v92_v56 = vld [vmem:[#allocation3 + $0x40] sm:$0xff]  ;;  %v93_v58 = vld [vmem:[#allocation3 + $0x48] sm:$0xff] }
  0x35   :  { %v88_v57 = vld [vmem:[#allocation3 + $0x20] sm:$0xff] }
  0x37   :  { %367 = vmatpush1.bf16.msra.mxu0 %v366_v26  ;;  %395 = vmatpush1.bf16.msra.mxu1 %v366_v26 }
  0x38   :  { %369 = vmatprep.subr.bf16.mxu0 %v368_v27  ;;  %388 = vmatprep.subr.bf16.mxu1 %v368_v27 }
  0x3b   :  { %371 = vmatpush1.bf16.msra.mxu0 %v370_v32  ;;  %396 = vmatpush1.bf16.msra.mxu1 %v370_v32 }
  0x3c   :  { %373 = vmatprep.subr.bf16.mxu0 %v372_v33  ;;  %389 = vmatprep.subr.bf16.mxu1 %v372_v33 }
  0x3f   :  { %375 = vmatpush1.bf16.msra.mxu0 %v374_v38  ;;  %397 = vmatpush1.bf16.msra.mxu1 %v374_v38 }
  0x40   :  { %377 = vmatprep.subr.bf16.mxu0 %v376_v39  ;;  %390 = vmatprep.subr.bf16.mxu1 %v376_v39 }
  0x43   :  { %379 = vmatpush1.bf16.msra.mxu0 %v378_v44  ;;  %398 = vmatpush1.bf16.msra.mxu1 %v378_v44 }
  0x44   :  { %381 = vmatprep.subr.bf16.mxu0 %v380_v45  ;;  %391 = vmatprep.subr.bf16.mxu1 %v380_v45 }
  0x47   :  { %383 = vmatpush1.bf16.msra.mxu0 %v382_v48  ;;  %399 = vmatpush1.bf16.msra.mxu1 %v382_v48 }
  0x4a   :  { %191 = vmatmul.mubr.f32.vlgmr.msra.gmra.mrb[0].mxu0 %v84_v49  ;;  %221 = vmatmul.mubr.f32.vlgmr.msra.gmra.mrb[0].mxu1 %v89_v50 }
  0x4b   :  { %196 = vmatprep.mubr.f32.mxu0 %v486_v0  ;;  %226 = vmatprep.mubr.f32.mxu1 %v486_v0 }
  0x4e   :  { %197 = vmatmul.mubr.f32.gmra.mrb[2].mxu0 %v85_v51  ;;  %227 = vmatmul.mubr.f32.gmra.mrb[2].mxu1 %v90_v52 }
  0x4f   :  { %202 = vmatprep.mubr.f32.mxu0 %v486_v0  ;;  %232 = vmatprep.mubr.f32.mxu1 %v486_v0 }
  0x52   :  { %203 = vmatmul.mubr.f32.gmra.mrb[4].mxu0 %v86_v53  ;;  %233 = vmatmul.mubr.f32.gmra.mrb[4].mxu1 %v91_v54 }
  0x53   :  { %208 = vmatprep.mubr.f32.mxu0 %v486_v0  ;;  %238 = vmatprep.mubr.f32.mxu1 %v486_v0 }
  0x56   :  { %209 = vmatmul.mubr.f32.gmra.mrb[6].mxu0 %v87_v55  ;;  %239 = vmatmul.mubr.f32.gmra.mrb[6].mxu1 %v92_v56 }
  0x57   :  { %214 = vmatprep.mubr.f32.mxu0 %v486_v0  ;;  %244 = vmatprep.mubr.f32.mxu1 %v486_v0 }
  0x5a   :  { %215 = vmatmul.mubr.f32.gmra.mrb[8].mxu0 %v88_v57  ;;  %245 = vmatmul.mubr.f32.gmra.mrb[8].mxu1 %v93_v58 }
 0x11d   :  { %v192_v59 = vpop.f32.mrb[0].mxu0  ;;  %v222_v60 = vpop.f32.mrb[0].mxu1 }
 0x11e   :  { %314 = vst [vmem:[#allocation8] sm:$0xff] %v192_v59  ;;  %324 = vst [vmem:[#allocation8 + $0x50] sm:$0xff] %v222_v60  ;;  %v194_v61 = vpop.f32.mrb[1].mxu0  ;;  %v224_v62 = vpop.f32.mrb[1].mxu1 }
 0x11f   :  { %315 = vst [vmem:[#allocation8 + $0x8] sm:$0xff] %v194_v61  ;;  %325 = vst [vmem:[#allocation8 + $0x58] sm:$0xff] %v224_v62 }
 0x121   :  { %v198_v63 = vpop.f32.mrb[2].mxu0  ;;  %v228_v1 = vpop.f32.mrb[2].mxu1 }
 0x122   :  { %316 = vst [vmem:[#allocation8 + $0x10] sm:$0xff] %v198_v63  ;;  %326 = vst [vmem:[#allocation8 + $0x60] sm:$0xff] %v228_v1  ;;  %v200_v2 = vpop.f32.mrb[3].mxu0  ;;  %v230_v3 = vpop.f32.mrb[3].mxu1 }
 0x123   :  { %317 = vst [vmem:[#allocation8 + $0x18] sm:$0xff] %v200_v2  ;;  %327 = vst [vmem:[#allocation8 + $0x68] sm:$0xff] %v230_v3 }
 0x125   :  { %v204_v0 = vpop.f32.mrb[4].mxu0  ;;  %v234_v4 = vpop.f32.mrb[4].mxu1 }
 0x126   :  { %318 = vst [vmem:[#allocation8 + $0x20] sm:$0xff] %v204_v0  ;;  %328 = vst [vmem:[#allocation8 + $0x70] sm:$0xff] %v234_v4  ;;  %v206_v5 = vpop.f32.mrb[5].mxu0  ;;  %v236_v6 = vpop.f32.mrb[5].mxu1 }
 0x127   :  { %319 = vst [vmem:[#allocation8 + $0x28] sm:$0xff] %v206_v5  ;;  %329 = vst [vmem:[#allocation8 + $0x78] sm:$0xff] %v236_v6 }
 0x129   :  { %v210_v7 = vpop.f32.mrb[6].mxu0  ;;  %v240_v8 = vpop.f32.mrb[6].mxu1 }
 0x12a   :  { %320 = vst [vmem:[#allocation8 + $0x30] sm:$0xff] %v210_v7  ;;  %330 = vst [vmem:[#allocation8 + $0x80] sm:$0xff] %v240_v8  ;;  %v212_v9 = vpop.f32.mrb[7].mxu0  ;;  %v242_v10 = vpop.f32.mrb[7].mxu1 }
 0x12b   :  { %321 = vst [vmem:[#allocation8 + $0x38] sm:$0xff] %v212_v9  ;;  %331 = vst [vmem:[#allocation8 + $0x88] sm:$0xff] %v242_v10 }
 0x12d   :  { %v216_v11 = vpop.f32.mrb[8].mxu0  ;;  %v246_v12 = vpop.f32.mrb[8].mxu1 }
 0x12e   :  { %322 = vst [vmem:[#allocation8 + $0x40] sm:$0xff] %v216_v11  ;;  %332 = vst [vmem:[#allocation8 + $0x90] sm:$0xff] %v246_v12  ;;  %v218_v13 = vpop.f32.mrb[9].mxu0  ;;  %v248_v14 = vpop.f32.mrb[9].mxu1 }
 0x12f   :  { %323 = vst [vmem:[#allocation8 + $0x48] sm:$0xff] %v218_v13  ;;  %333 = vst [vmem:[#allocation8 + $0x98] sm:$0xff] %v248_v14 }
 0x130   :  { %463 = shalt.err (!%p460_p6)
}
 0x131   :  { %s464_s12 = scalar_lea.hbm %s557_s2, 2560 }
 0x132   :  { %p465_p7 = scmp.ne.s32.totalorder %s557_s2, %s464_s12  ;;  %p468_p8 = scmp.lt.u32.totalorder %s464_s12, %s557_s2 }
 0x134   :  { %p470_p9 = pnand %p468_p8, %p465_p7 }
 0x136   :  { %473 = shalt.err (!%p470_p9)
}
 0x137   :  { %345 = dma.vmem_to_hbm [thread:$0]  %s340_s8, 2560, %s557_s2, [#allocation5], %s484_s0, %s484_s0, %s485_s5  }
 0x138   :  { %478 = dma.done.wait [#allocation5], 2560  }
 0x139   :  { %479 = vsyncadd [#allocation5], 4294964736 }
 0x13a   :  { %349 = vsyncpa [#allocation4], 1 }
 0x13b   :  { %350 = vsyncpa [#allocation7], 1 }
 0x13c   :  { %351 = vsyncpa [#allocation5], 1 }

</bundles_post_ra>
